<compile_context>
chip_gen: v7x
topology: tpu7x:2x2x1
jax: 0.10.0
libtpu: 0.0.40
codegen_flags: <defaults>
</compile_context>

<pallas_src>
import functools

import jax
import jax.numpy as jnp
from jax.experimental import pallas as pl
from jax.experimental.pallas import tpu as pltpu


def _round_up(n, m):
    return ((n + m - 1) // m) * m


def _coupling_kernel(*refs, n_mid, reverse, compute_dtype):
    """out = x +/- scatter_to_off_lanes(MLP(gather_on_lanes(x))).

    The gather/scatter is folded into the (pre-expanded, zero-padded)
    first/last weight matrices, so the kernel is dense MXU matmuls on full
    (TILE_B, D) tiles.
    """
    if n_mid > 0:
        (x_ref, w_in_ref, b_in_ref, wm_ref, bm_ref,
         w_out_ref, b_out_ref, out_ref) = refs
    else:
        x_ref, w_in_ref, b_in_ref, w_out_ref, b_out_ref, out_ref = refs
        wm_ref = bm_ref = None

    x = x_ref[...]                                           # (TILE_B, D) f32
    h = jnp.dot(x.astype(compute_dtype), w_in_ref[...],
                preferred_element_type=jnp.float32) + b_in_ref[...]
    h = jnp.maximum(h, 0.0)
    for i in range(n_mid):               # static unroll over the middle layers
        h = jnp.dot(h.astype(compute_dtype), wm_ref[i],
                    preferred_element_type=jnp.float32) + bm_ref[i]
        h = jnp.maximum(h, 0.0)
    shift = jnp.dot(h.astype(compute_dtype), w_out_ref[...],
                    preferred_element_type=jnp.float32) + b_out_ref[...]
    # shift is exactly zero on the "on" lanes, so only the "off" half changes.
    out_ref[...] = (x - shift) if reverse else (x + shift)


def _const_spec(arr, single_buffer):
    """Constant-index (VMEM-resident across batch tiles) BlockSpec.

    When `single_buffer` is set and the installed JAX supports pipeline_mode,
    the block is requested single-buffered: a constant-index input is fetched
    once, so the default double-buffering only wastes VMEM (critical at real
    NICE sizes on v5e's 16 MiB default scope).
    """
    nd = arr.ndim

    def idx(*_):
        return (0,) * nd

    if single_buffer and hasattr(pl, "Buffered"):
        try:
            return pl.BlockSpec(arr.shape, idx, pipeline_mode=pl.Buffered(1))
        except Exception:  # older JAX without pipeline_mode support
            pass
    return pl.BlockSpec(arr.shape, idx)


class AdditiveCouplingPallas:
    """JAX/Pallas port of the NICE AdditiveCoupling layer."""

    MAX_TILE_B = 4096            # diminishing returns past a few thousand rows
    VMEM_BUDGET = 12 << 20       # working-set budget; fits v5e's 16 MiB scope
    VMEM_LIMIT = 32 << 20        # raised scoped limit; safe on v5e/v6e/v7x
    SINGLE_BUF_WEIGHT_BYTES = 1 << 20  # single-buffer weights past this size

    def __init__(self, in_out_dim, mid_dim, hidden, mask_config, key,
                 compute_dtype=jnp.bfloat16):
        assert in_out_dim % 2 == 0
        self.in_out_dim = in_out_dim
        self.mid_dim = mid_dim
        self.hidden = hidden
        self.mask_config = mask_config
        self.compute_dtype = compute_dtype
        half = in_out_dim // 2
        n_mid = hidden - 1
        self.n_mid = n_mid
        mid_pad = _round_up(mid_dim, 128)
        self.mid_pad = mid_pad

        # mask_config == 1 -> odd units are transformed ("off"), even pass through.
        parity_on = 0 if mask_config else 1
        parity_off = 1 - parity_on

        ks = jax.random.split(key, 3 + 2 * max(n_mid, 1))
        s_in = 1.0 / jnp.sqrt(half)
        s_mid = 1.0 / jnp.sqrt(mid_dim)
        # Raw parameters (PyTorch-Linear-like uniform init), f32, used by the
        # pure-JAX reference.
        w_in = jax.random.uniform(ks[0], (half, mid_dim), jnp.float32, -s_in, s_in)
        b_in = jax.random.uniform(ks[1], (1, mid_dim), jnp.float32, -s_in, s_in)
        if n_mid > 0:
            w_mid = jnp.stack([
                jax.random.uniform(ks[3 + i], (mid_dim, mid_dim), jnp.float32,
                                   -s_mid, s_mid) for i in range(n_mid)])
            b_mid = jnp.stack([
                jax.random.uniform(ks[3 + n_mid + i], (1, mid_dim), jnp.float32,
                                   -s_mid, s_mid) for i in range(n_mid)])
        else:
            w_mid = None
            b_mid = None
        w_out = jax.random.uniform(ks[2], (mid_dim, half), jnp.float32, -s_mid, s_mid)
        b_out = jax.random.uniform(jax.random.fold_in(ks[2], 7), (1, half),
                                   jnp.float32, -s_mid, s_mid)

        self.w_in_raw, self.b_in_raw = w_in, b_in
        self.w_mid_raw, self.b_mid_raw = w_mid, b_mid
        self.w_out_raw, self.b_out_raw = w_out, b_out

        # Kernel-side parameters: interleave folded in + mid_dim zero-padded to
        # a multiple of 128. Exact: padded hidden units get zero weights and
        # zero bias -> ReLU(0)=0 feeding all-zero weight rows downstream.
        #   x @ w_in_exp              == on @ w_in  (padded cols = 0)
        #   h @ w_out_exp + b_out_exp == scatter(h[:, :mid] @ w_out + b_out -> off lanes)
        w_in_exp = jnp.zeros((in_out_dim, mid_pad), jnp.float32)
        w_in_exp = w_in_exp.at[parity_on::2, :mid_dim].set(w_in)
        b_in_p = jnp.zeros((1, mid_pad), jnp.float32).at[:, :mid_dim].set(b_in)
        if n_mid > 0:
            w_mid_p = jnp.zeros((n_mid, mid_pad, mid_pad), jnp.float32)
            w_mid_p = w_mid_p.at[:, :mid_dim, :mid_dim].set(w_mid)
            b_mid_p = jnp.zeros((n_mid, 1, mid_pad), jnp.float32)
            b_mid_p = b_mid_p.at[:, :, :mid_dim].set(b_mid)
        else:
            w_mid_p = b_mid_p = None
        w_out_exp = jnp.zeros((mid_pad, in_out_dim), jnp.float32)
        w_out_exp = w_out_exp.at[:mid_dim, parity_off::2].set(w_out)
        b_out_exp = jnp.zeros((1, in_out_dim), jnp.float32)
        b_out_exp = b_out_exp.at[:, parity_off::2].set(b_out)

        cd = compute_dtype
        self.w_in = w_in_exp.astype(cd)                         # (D, mid_pad)
        self.b_in = b_in_p                                      # (1, mid_pad) f32
        self.w_mid = w_mid_p.astype(cd) if n_mid > 0 else None  # (n_mid, mid_pad, mid_pad)
        self.b_mid = b_mid_p                                    # (n_mid, 1, mid_pad) f32
        self.w_out = w_out_exp.astype(cd)                       # (mid_pad, D)
        self.b_out = b_out_exp                                  # (1, D) f32

        w_itemsize = jnp.dtype(cd).itemsize
        self._weight_bytes = (
            (in_out_dim * mid_pad + n_mid * mid_pad * mid_pad
             + mid_pad * in_out_dim) * w_itemsize
            + ((1 + n_mid) * mid_pad + in_out_dim) * 4)
        self._single_buffer_weights = (
            self._weight_bytes > self.SINGLE_BUF_WEIGHT_BYTES)

    def _derive_tile_b(self, B):
        """VMEM-budget-derived batch tile (multiple of 8)."""
        D, mid_pad = self.in_out_dim, self.mid_pad
        w_itemsize = jnp.dtype(self.compute_dtype).itemsize
        # Per-row working set: double-buffered f32 x/out tiles + f32 hidden /
        # shift temporaries + their compute-dtype casts (generous estimate).
        per_row = (4 * 4 * D                          # x + out, double-buffered
                   + 4 * (3 * mid_pad + D)            # f32 hidden/shift temps
                   + w_itemsize * (D + 2 * mid_pad))  # casts fed to the MXU
        avail = max(self.VMEM_BUDGET - self._weight_bytes, 2 << 20)
        tile_b = min(avail // per_row, self.MAX_TILE_B)
        # Megacore: keep >= 2 grid steps whenever B spans more than one tile
        # so the ("parallel",) batch axis can shard across v7x's two TCs.
        tile_b = min(tile_b, _round_up(-(-B // 2), 8))
        tile_b = max((tile_b // 8) * 8, 8)
        return int(tile_b)

    def _run_kernel(self, x, reverse):
        B, D = x.shape
        tile_b = self._derive_tile_b(B)
        # cdiv grid: the ragged last block gets padded reads / masked stores,
        # no jnp.pad / out[:B] round-trip over HBM.
        grid = (pl.cdiv(B, tile_b),)

        kernel = functools.partial(_coupling_kernel, n_mid=self.n_mid,
                                   reverse=reverse,
                                   compute_dtype=self.compute_dtype)

        sb = self._single_buffer_weights
        x_spec = pl.BlockSpec((tile_b, D), lambda i: (i, 0))
        out_spec = pl.BlockSpec((tile_b, D), lambda i: (i, 0))

        inputs = [x, self.w_in, self.b_in]
        in_specs = [x_spec, _const_spec(self.w_in, sb), _const_spec(self.b_in, sb)]
        if self.n_mid > 0:
            inputs += [self.w_mid, self.b_mid]
            in_specs += [_const_spec(self.w_mid, sb), _const_spec(self.b_mid, sb)]
        inputs += [self.w_out, self.b_out]
        in_specs += [_const_spec(self.w_out, sb), _const_spec(self.b_out, sb)]

        return pl.pallas_call(
            kernel,
            out_shape=jax.ShapeDtypeStruct((B, D), x.dtype),
            grid_spec=pltpu.PrefetchScalarGridSpec(
                num_scalar_prefetch=0,
                grid=grid,
                in_specs=in_specs,
                out_specs=out_spec),
            compiler_params=pltpu.CompilerParams(
                dimension_semantics=("parallel",),
                vmem_limit_bytes=self.VMEM_LIMIT),
        )(*inputs)

    def __call__(self, x, log_det_J, reverse=False):
        assert x.ndim == 2 and x.shape[1] == self.in_out_dim
        out = self._run_kernel(x, reverse)
        # Additive coupling: unit Jacobian -> log_det_J unchanged.
        return out, log_det_J


def _reference(layer, x, log_det_J, reverse=False):
    """Plain-JAX reference using the same matmul precision as the kernel."""
    cd = layer.compute_dtype
    B, W = x.shape
    xr = x.reshape(B, W // 2, 2)
    if layer.mask_config:
        on, off = xr[:, :, 0], xr[:, :, 1]
    else:
        off, on = xr[:, :, 0], xr[:, :, 1]
    h = jnp.dot(on.astype(cd), layer.w_in_raw.astype(cd),
                preferred_element_type=jnp.float32) + layer.b_in_raw
    h = jnp.maximum(h, 0.0)
    for i in range(layer.n_mid):
        h = jnp.dot(h.astype(cd), layer.w_mid_raw[i].astype(cd),
                    preferred_element_type=jnp.float32) + layer.b_mid_raw[i]
        h = jnp.maximum(h, 0.0)
    shift = jnp.dot(h.astype(cd), layer.w_out_raw.astype(cd),
                    preferred_element_type=jnp.float32) + layer.b_out_raw
    off = off - shift if reverse else off + shift
    if layer.mask_config:
        out = jnp.stack((on, off), axis=2)
    else:
        out = jnp.stack((off, on), axis=2)
    return out.reshape(B, W), log_det_J


if __name__ == "__main__":
    key = jax.random.PRNGKey(0)
    k_x, k_p, k_x2 = jax.random.split(key, 3)

    in_out_dim = 128
    mid_dim = 64          # exercises the zero-pad-to-128 path
    hidden = 3
    mask_config = 1

    layer = AdditiveCouplingPallas(in_out_dim, mid_dim, hidden, mask_config, k_p)
    log_det_J = jnp.zeros((), jnp.float32)

    # --- main check: small batch, forward + reverse (invertibility) ---
    B = 8
    x = jax.random.normal(k_x, (B, in_out_dim), jnp.float32)
    y, ldj = layer(x, log_det_J, reverse=False)
    y = jax.block_until_ready(y)
    y_ref, _ = _reference(layer, x, log_det_J, reverse=False)
    assert jnp.allclose(y, y_ref, atol=2e-3, rtol=2e-3), "forward mismatch"

    x_rec, _ = layer(y, ldj, reverse=True)
    x_rec = jax.block_until_ready(x_rec)
    assert jnp.allclose(x_rec, x, atol=1e-4, rtol=1e-4), "inverse mismatch"

    # --- ragged batch: B not a multiple of the tile -> masked last block ---
    B2 = 20
    x2 = jax.random.normal(k_x2, (B2, in_out_dim), jnp.float32)
    y2, _ = layer(x2, log_det_J, reverse=False)
    y2 = jax.block_until_ready(y2)
    y2_ref, _ = _reference(layer, x2, log_det_J, reverse=False)
    assert jnp.allclose(y2, y2_ref, atol=2e-3, rtol=2e-3), "ragged forward mismatch"

    print("KERNEL_OK")
</pallas_src>

<mosaic_0001>
module attributes {stable_mosaic.version = 11 : i64} {
  func.func @_coupling_kernel(%arg0: i32, %arg1: memref<8x128xf32, #tpu.memory_space<vmem>>, %arg2: memref<128x128xbf16, #tpu.memory_space<vmem>>, %arg3: memref<1x128xf32, #tpu.memory_space<vmem>>, %arg4: memref<2x128x128xbf16, #tpu.memory_space<vmem>>, %arg5: memref<2x1x128xf32, #tpu.memory_space<vmem>>, %arg6: memref<128x128xbf16, #tpu.memory_space<vmem>>, %arg7: memref<1x128xf32, #tpu.memory_space<vmem>>, %arg8: memref<8x128xf32, #tpu.memory_space<vmem>>) attributes {dimension_semantics = [#tpu.dimension_semantics<parallel>], iteration_bounds = array<i64: 1>, scalar_prefetch = 0 : i64, scratch_operands = 0 : i64, tpu.core_type = #tpu.core_type<tc>, window_params = [{transform_indices = @transform_0, window_bounds = array<i64: 8, 128>}, {pipeline_mode = #tpu.pipeline_mode<synchronous>, transform_indices = @transform_1, window_bounds = array<i64: 128, 128>}, {pipeline_mode = #tpu.pipeline_mode<synchronous>, transform_indices = @transform_2, window_bounds = array<i64: 1, 128>}, {pipeline_mode = #tpu.pipeline_mode<synchronous>, transform_indices = @transform_3, window_bounds = array<i64: 2, 128, 128>}, {pipeline_mode = #tpu.pipeline_mode<synchronous>, transform_indices = @transform_4, window_bounds = array<i64: 2, 1, 128>}, {pipeline_mode = #tpu.pipeline_mode<synchronous>, transform_indices = @transform_5, window_bounds = array<i64: 128, 128>}, {pipeline_mode = #tpu.pipeline_mode<synchronous>, transform_indices = @transform_6, window_bounds = array<i64: 1, 128>}, {transform_indices = @transform_7, window_bounds = array<i64: 8, 128>}]} {
    %c0 = arith.constant 0 : index
    %c0_0 = arith.constant 0 : index
    %0 = vector.load %arg1[%c0, %c0_0] : memref<8x128xf32, #tpu.memory_space<vmem>>, vector<8x128xf32>
    %1 = arith.truncf %0 : vector<8x128xf32> to vector<8x128xbf16>
    %c0_1 = arith.constant 0 : index
    %c0_2 = arith.constant 0 : index
    %2 = vector.load %arg2[%c0_1, %c0_2] : memref<128x128xbf16, #tpu.memory_space<vmem>>, vector<128x128xbf16>
    %cst = arith.constant dense<0.000000e+00> : vector<8x128xf32>
    %3 = tpu.matmul %1, %2, %cst {dimension_numbers = #tpu.dot_dimension_numbers<[1], [0], [0], [1], [0, 0, 1, 1], [], []>} : vector<8x128xbf16>, vector<128x128xbf16>, vector<8x128xf32> -> vector<8x128xf32>
    %c0_3 = arith.constant 0 : index
    %c0_4 = arith.constant 0 : index
    %4 = vector.load %arg3[%c0_3, %c0_4] : memref<1x128xf32, #tpu.memory_space<vmem>>, vector<1x128xf32>
    %5 = vector.broadcast %4 : vector<1x128xf32> to vector<8x128xf32>
    %6 = arith.addf %3, %5 : vector<8x128xf32>
    %cst_5 = arith.constant 0.000000e+00 : f32
    %7 = vector.broadcast %cst_5 : f32 to vector<8x128xf32>
    %8 = arith.maximumf %6, %7 : vector<8x128xf32>
    %9 = arith.truncf %8 : vector<8x128xf32> to vector<8x128xbf16>
    %c0_6 = arith.constant 0 : index
    %c0_7 = arith.constant 0 : index
    %c0_8 = arith.constant 0 : index
    %10 = vector.load %arg4[%c0_6, %c0_7, %c0_8] : memref<2x128x128xbf16, #tpu.memory_space<vmem>>, vector<1x128x128xbf16>
    %11 = vector.shape_cast %10 : vector<1x128x128xbf16> to vector<128x128xbf16>
    %cst_9 = arith.constant dense<0.000000e+00> : vector<8x128xf32>
    %12 = tpu.matmul %9, %11, %cst_9 {dimension_numbers = #tpu.dot_dimension_numbers<[1], [0], [0], [1], [0, 0, 1, 1], [], []>} : vector<8x128xbf16>, vector<128x128xbf16>, vector<8x128xf32> -> vector<8x128xf32>
    %c0_10 = arith.constant 0 : index
    %c0_11 = arith.constant 0 : index
    %c0_12 = arith.constant 0 : index
    %13 = vector.load %arg5[%c0_10, %c0_11, %c0_12] : memref<2x1x128xf32, #tpu.memory_space<vmem>>, vector<1x1x128xf32>
    %14 = vector.shape_cast %13 : vector<1x1x128xf32> to vector<1x128xf32>
    %15 = vector.broadcast %14 : vector<1x128xf32> to vector<8x128xf32>
    %16 = arith.addf %12, %15 : vector<8x128xf32>
    %cst_13 = arith.constant 0.000000e+00 : f32
    %17 = vector.broadcast %cst_13 : f32 to vector<8x128xf32>
    %18 = arith.maximumf %16, %17 : vector<8x128xf32>
    %19 = arith.truncf %18 : vector<8x128xf32> to vector<8x128xbf16>
    %c1 = arith.constant 1 : index
    %c0_14 = arith.constant 0 : index
    %c0_15 = arith.constant 0 : index
    %20 = vector.load %arg4[%c1, %c0_14, %c0_15] : memref<2x128x128xbf16, #tpu.memory_space<vmem>>, vector<1x128x128xbf16>
    %21 = vector.shape_cast %20 : vector<1x128x128xbf16> to vector<128x128xbf16>
    %cst_16 = arith.constant dense<0.000000e+00> : vector<8x128xf32>
    %22 = tpu.matmul %19, %21, %cst_16 {dimension_numbers = #tpu.dot_dimension_numbers<[1], [0], [0], [1], [0, 0, 1, 1], [], []>} : vector<8x128xbf16>, vector<128x128xbf16>, vector<8x128xf32> -> vector<8x128xf32>
    %c1_17 = arith.constant 1 : index
    %c0_18 = arith.constant 0 : index
    %c0_19 = arith.constant 0 : index
    %23 = vector.load %arg5[%c1_17, %c0_18, %c0_19] : memref<2x1x128xf32, #tpu.memory_space<vmem>>, vector<1x1x128xf32>
    %24 = vector.shape_cast %23 : vector<1x1x128xf32> to vector<1x128xf32>
    %25 = vector.broadcast %24 : vector<1x128xf32> to vector<8x128xf32>
    %26 = arith.addf %22, %25 : vector<8x128xf32>
    %cst_20 = arith.constant 0.000000e+00 : f32
    %27 = vector.broadcast %cst_20 : f32 to vector<8x128xf32>
    %28 = arith.maximumf %26, %27 : vector<8x128xf32>
    %29 = arith.truncf %28 : vector<8x128xf32> to vector<8x128xbf16>
    %c0_21 = arith.constant 0 : index
    %c0_22 = arith.constant 0 : index
    %30 = vector.load %arg6[%c0_21, %c0_22] : memref<128x128xbf16, #tpu.memory_space<vmem>>, vector<128x128xbf16>
    %cst_23 = arith.constant dense<0.000000e+00> : vector<8x128xf32>
    %31 = tpu.matmul %29, %30, %cst_23 {dimension_numbers = #tpu.dot_dimension_numbers<[1], [0], [0], [1], [0, 0, 1, 1], [], []>} : vector<8x128xbf16>, vector<128x128xbf16>, vector<8x128xf32> -> vector<8x128xf32>
    %c0_24 = arith.constant 0 : index
    %c0_25 = arith.constant 0 : index
    %32 = vector.load %arg7[%c0_24, %c0_25] : memref<1x128xf32, #tpu.memory_space<vmem>>, vector<1x128xf32>
    %33 = vector.broadcast %32 : vector<1x128xf32> to vector<8x128xf32>
    %34 = arith.addf %31, %33 : vector<8x128xf32>
    %35 = arith.addf %0, %34 : vector<8x128xf32>
    %c0_26 = arith.constant 0 : index
    %c0_27 = arith.constant 0 : index
    %36 = vector.load %arg8[%c0_26, %c0_27] : memref<8x128xf32, #tpu.memory_space<vmem>>, vector<8x128xf32>
    tpu.vector_store %arg8[%c0_26, %c0_27], %35 {strides = array<i32>} : memref<8x128xf32, #tpu.memory_space<vmem>>, vector<8x128xf32>,
    return
  }
  func.func @transform_0(%arg0: i32) -> (i32, i32) {
    %c0_i32 = arith.constant 0 : i32
    %c0_i32_0 = arith.constant 0 : i32
    return %arg0, %c0_i32 : i32, i32
  }
  func.func @transform_1(%arg0: i32) -> (i32, i32) {
    %c0_i32 = arith.constant 0 : i32
    %c0_i32_0 = arith.constant 0 : i32
    %c0_i32_1 = arith.constant 0 : i32
    return %c0_i32, %c0_i32_0 : i32, i32
  }
  func.func @transform_2(%arg0: i32) -> (i32, i32) {
    %c0_i32 = arith.constant 0 : i32
    %c0_i32_0 = arith.constant 0 : i32
    %c0_i32_1 = arith.constant 0 : i32
    return %c0_i32, %c0_i32_0 : i32, i32
  }
  func.func @transform_3(%arg0: i32) -> (i32, i32, i32) {
    %c0_i32 = arith.constant 0 : i32
    %c0_i32_0 = arith.constant 0 : i32
    %c0_i32_1 = arith.constant 0 : i32
    %c0_i32_2 = arith.constant 0 : i32
    return %c0_i32, %c0_i32_0, %c0_i32_1 : i32, i32, i32
  }
  func.func @transform_4(%arg0: i32) -> (i32, i32, i32) {
    %c0_i32 = arith.constant 0 : i32
    %c0_i32_0 = arith.constant 0 : i32
    %c0_i32_1 = arith.constant 0 : i32
    %c0_i32_2 = arith.constant 0 : i32
    return %c0_i32, %c0_i32_0, %c0_i32_1 : i32, i32, i32
  }
  func.func @transform_5(%arg0: i32) -> (i32, i32) {
    %c0_i32 = arith.constant 0 : i32
    %c0_i32_0 = arith.constant 0 : i32
    %c0_i32_1 = arith.constant 0 : i32
    return %c0_i32, %c0_i32_0 : i32, i32
  }
  func.func @transform_6(%arg0: i32) -> (i32, i32) {
    %c0_i32 = arith.constant 0 : i32
    %c0_i32_0 = arith.constant 0 : i32
    %c0_i32_1 = arith.constant 0 : i32
    return %c0_i32, %c0_i32_0 : i32, i32
  }
  func.func @transform_7(%arg0: i32) -> (i32, i32) {
    %c0_i32 = arith.constant 0 : i32
    %c0_i32_0 = arith.constant 0 : i32
    return %arg0, %c0_i32 : i32, i32
  }
}

</mosaic_0001>

<bundles_post_ra>
// kernel: tpu_custom_call.1
= control target key start
LH: loop header
LB: loop body
LE: loop exit
PB: predicated region body
PF: predicated region fallthrough
CT: control target
= control target key end

     0   :  { %12 = vsyncpa [#allocation3], 0  ;;  %s1041_s0 = inlined_call_operand.hbm [shape: f32[8,128], index: 0, kind: input, shape index: {}]   ;;  %s1042_s1 = inlined_call_operand.hbm [shape: bf16[128,128], index: 1, kind: input, shape index: {}]   ;;  %s1043_s2 = inlined_call_operand.vmem [shape: f32[1,128], index: 2, kind: input, shape index: {}]   ;;  %s1044_s3 = inlined_call_operand.hbm [shape: bf16[2,128,128], index: 3, kind: input, shape index: {}]   ;;  %s1045_s4 = inlined_call_operand.vmem [shape: f32[2,1,128], index: 4, kind: input, shape index: {}]   ;;  %s1046_s5 = inlined_call_operand.hbm [shape: bf16[128,128], index: 5, kind: input, shape index: {}]   ;;  %s1047_s6 = inlined_call_operand.vmem [shape: f32[1,128], index: 6, kind: input, shape index: {}]   ;;  %s1048_s7 = inlined_call_operand.hbm [shape: f32[8,128], index: 7, kind: output, shape index: {}]  }
   0x1   :  { %13 = vsyncpa [#allocation6], 0 }
   0x2   :  { %14 = vsyncpa [#allocation9], 0 }
   0x3   :  { %15 = vsyncpa [#allocation4], 0  ;;  %s866_s24 = smov [#allocation5]   ;;  %s748_s28 = scalar_lea.hbm %s1042_s1, 1024 }
   0x4   :  { %s31_s25 = sshll.u32 %s866_s24, 4  ;;  %p749_p0 = scmp.ne.s32.totalorder %s1042_s1, %s748_s28  ;;  %s32_s25 = int_to_ptr.vmem [resolvable:$true] %s31_s25 }
   0x5   :  { %p752_p1 = scmp.lt.u32.totalorder %s748_s28, %s1042_s1 }
   0x7   :  { %p754_p2 = pnand %p752_p1, %p749_p0 }
   0x9   :  { %757 = shalt.err (!%p754_p2)
}
   0xa   :  { %s758_s10 = scalar_lea.vmem %s32_s25, 1024  ;;  %p763_p4 = scmp.lt.s32.totalorder %s32_s25, %s32_s25 }
   0xb   :  { %p759_p3 = scmp.ne.s32.totalorder %s32_s25, %s758_s10  ;;  %p764_p5 = scmp.lt.s32.totalorder %s758_s10, %s758_s10 }
   0xd   :  { %p765_p6 = por %p764_p5, %p763_p4 }
   0xf   :  { %p766_p7 = pnand %p765_p6, %p759_p3 }
  0x11   :  { %769 = shalt.err (!%p766_p7)
}
  0x12   :  { %s867_s11 = smov 64   ;;  %s868_s12 = smov 4  }
  0x13   :  { %37 = dma.hbm_to_vmem [thread:$0]  %s1042_s1, 1024, %s32_s25, [#allocation6], %s867_s11, %s867_s11, %s868_s12  }
  0x14   :  { %s869_s15 = smov [#allocation2]   ;;  %s870_s17 = smov [#allocation7]  }
  0x15   :  { %s22_s16 = sshll.u32 %s869_s15, 4  ;;  %s45_s18 = sshll.u32 %s870_s17, 4  ;;  %s23_s16 = int_to_ptr.vmem [resolvable:$true] %s22_s16  ;;  %s46_s18 = int_to_ptr.vmem [resolvable:$true] %s45_s18 }
  0x16   :  { %s770_s21 = scalar_lea.hbm %s1041_s0, 128 }
  0x17   :  { %p771_p8 = scmp.ne.s32.totalorder %s1041_s0, %s770_s21  ;;  %p774_p9 = scmp.lt.u32.totalorder %s770_s21, %s1041_s0 }
  0x19   :  { %p776_p10 = pnand %p774_p9, %p771_p8 }
  0x1b   :  { %779 = shalt.err (!%p776_p10)
}
  0x1c   :  { %s780_s1 = scalar_lea.vmem %s23_s16, 128  ;;  %p785_p12 = scmp.lt.s32.totalorder %s23_s16, %s23_s16 }
  0x1d   :  { %p781_p11 = scmp.ne.s32.totalorder %s23_s16, %s780_s1  ;;  %p786_p13 = scmp.lt.s32.totalorder %s780_s1, %s780_s1 }
  0x1f   :  { %p787_p0 = por %p786_p13, %p785_p12 }
  0x21   :  { %p788_p1 = pnand %p787_p0, %p781_p11 }
  0x23   :  { %791 = shalt.err (!%p788_p1)
}
  0x24   :  { %25 = dma.hbm_to_vmem [thread:$0]  %s1041_s0, 128, %s23_s16, [#allocation3]  }
  0x25   :  { %s792_s30 = scalar_lea.hbm %s1044_s3, 2048 }
  0x26   :  { %p793_p2 = scmp.ne.s32.totalorder %s1044_s3, %s792_s30  ;;  %p796_p3 = scmp.lt.u32.totalorder %s792_s30, %s1044_s3 }
  0x28   :  { %p798_p4 = pnand %p796_p3, %p793_p2 }
  0x2a   :  { %801 = shalt.err (!%p798_p4)
}
  0x2b   :  { %s802_s14 = scalar_lea.vmem %s46_s18, 2048  ;;  %p807_p6 = scmp.lt.s32.totalorder %s46_s18, %s46_s18 }
  0x2c   :  { %p803_p5 = scmp.ne.s32.totalorder %s46_s18, %s802_s14  ;;  %p808_p7 = scmp.lt.s32.totalorder %s802_s14, %s802_s14 }
  0x2e   :  { %p809_p8 = por %p808_p7, %p807_p6 }
  0x30   :  { %p810_p9 = pnand %p809_p8, %p803_p5 }
  0x32   :  { %813 = shalt.err (!%p810_p9)
}
  0x33   :  { %51 = dma.hbm_to_vmem [thread:$0]  %s1044_s3, 2048, %s46_s18, [#allocation6], %s867_s11, %s867_s11, %s868_s12  }
  0x34   :  { %s871_s16 = smov [#allocation8]   ;;  %s814_s21 = scalar_lea.hbm %s1046_s5, 1024 }
  0x35   :  { %s59_s17 = sshll.u32 %s871_s16, 4  ;;  %p815_p10 = scmp.ne.s32.totalorder %s1046_s5, %s814_s21  ;;  %s60_s17 = int_to_ptr.vmem [resolvable:$true] %s59_s17 }
  0x36   :  { %p818_p11 = scmp.lt.u32.totalorder %s814_s21, %s1046_s5 }
  0x38   :  { %p820_p12 = pnand %p818_p11, %p815_p10 }
  0x3a   :  { %823 = shalt.err (!%p820_p12)
}
  0x3b   :  { %s824_s1 = scalar_lea.vmem %s60_s17, 1024  ;;  %p829_p0 = scmp.lt.s32.totalorder %s60_s17, %s60_s17 }
  0x3c   :  { %p825_p13 = scmp.ne.s32.totalorder %s60_s17, %s824_s1  ;;  %p830_p1 = scmp.lt.s32.totalorder %s824_s1, %s824_s1 }
  0x3e   :  { %p831_p2 = por %p830_p1, %p829_p0 }
  0x40   :  { %p832_p3 = pnand %p831_p2, %p825_p13 }
  0x42   :  { %835 = shalt.err (!%p832_p3)
}
  0x43   :  { %65 = dma.hbm_to_vmem [thread:$0]  %s1046_s5, 1024, %s60_s17, [#allocation9], %s867_s11, %s867_s11, %s868_s12  }
  0x44   :  { %858 = dma.done.wait [#allocation3], 128  }
  0x45   :  { %859 = vsyncadd [#allocation3], 4294967168 }
  0x46   :  { %860 = dma.done.wait [#allocation6], 3072  }
  0x47   :  { %861 = vsyncadd [#allocation6], 4294964224 }
  0x48   :  { %862 = dma.done.wait [#allocation9], 1024  }
  0x49   :  { %863 = vsyncadd [#allocation9], 4294966272  ;;  %v872_v0 = vmov 0.0   ;;  %vm873_vm0 = vmmov 0   ;;  %v716_v1 = vld [vmem:[#allocation5] sm:$0xff]   ;;  %v717_v2 = vld [vmem:[#allocation5 + $0x8] sm:$0xff]  }
  0x4a   :  { %627 = vmatprep.subr.bf16.mxu0 %v872_v0  ;;  %643 = vmatprep.mubr.msk.bf16.mxu0 %vm873_vm0, %v872_v0  ;;  %v718_v3 = vld [vmem:[#allocation5 + $0x10] sm:$0xff]   ;;  %v724_v4 = vld [vmem:[#allocation7] sm:$0xff]   ;;  %v719_v5 = vld [vmem:[#allocation5 + $0x18] sm:$0xff]   ;;  %s874_s30 = smov [#allocation10]  }
  0x4b   :  { %647 = vmatprep.subr.bf16.mxu1 %v872_v0  ;;  %663 = vmatprep.mubr.msk.bf16.mxu1 %vm873_vm0, %v872_v0  ;;  %v725_v6 = vld [vmem:[#allocation7 + $0x8] sm:$0xff]   ;;  %v720_v7 = vld [vmem:[#allocation5 + $0x20] sm:$0xff]   ;;  %v726_v8 = vld [vmem:[#allocation7 + $0x10] sm:$0xff]   ;;  %s543_s8 = sshll.u32 %s874_s30, 4  ;;  %s544_s8 = int_to_ptr.vmem [resolvable:$true] %s543_s8 }
  0x4c   :  { %628 = vmatpush3.bf16.msra.mxu0 %v716_v1  ;;  %648 = vmatpush3.bf16.msra.mxu1 %v724_v4  ;;  %v721_v9 = vld [vmem:[#allocation5 + $0x28] sm:$0xff]   ;;  %v727_v10 = vld [vmem:[#allocation7 + $0x18] sm:$0xff]   ;;  %v722_v11 = vld [vmem:[#allocation5 + $0x30] sm:$0xff]   ;;  %p841_p5 = scmp.lt.s32.totalorder %s544_s8, %s544_s8 }
  0x4d   :  { %629 = vmatprep.subr.bf16.mxu0 %v872_v0  ;;  %649 = vmatprep.subr.bf16.mxu1 %v872_v0  ;;  %v728_v12 = vld [vmem:[#allocation7 + $0x20] sm:$0xff]   ;;  %v723_v13 = vld [vmem:[#allocation5 + $0x38] sm:$0xff]   ;;  %v729_v15 = vld [vmem:[#allocation7 + $0x28] sm:$0xff]  }
  0x4e   :  { %v988_v14 = vld [vmem:[#allocation2] sm:$0xff]  ;;  %v730_v17 = vld [vmem:[#allocation7 + $0x30] sm:$0xff]   ;;  %v732_v19 = vld [vmem:[#allocation7 + $0x40] sm:$0xff]  }
  0x4f   :  { %v82_v16 = vpack.c.bf16 %v988_v14, %v988_v14  ;;  %v731_v18 = vld [vmem:[#allocation7 + $0x38] sm:$0xff]   ;;  %v733_v20 = vld [vmem:[#allocation7 + $0x48] sm:$0xff]   ;;  %v734_v21 = vld [vmem:[#allocation7 + $0x50] sm:$0xff]  }
  0x50   :  { %630 = vmatpush3.bf16.msra.mxu0 %v717_v2  ;;  %650 = vmatpush3.bf16.msra.mxu1 %v725_v6  ;;  %v735_v22 = vld [vmem:[#allocation7 + $0x58] sm:$0xff]   ;;  %v736_v23 = vld [vmem:[#allocation7 + $0x60] sm:$0xff]   ;;  %v737_v24 = vld [vmem:[#allocation7 + $0x68] sm:$0xff]  }
  0x51   :  { %631 = vmatprep.subr.bf16.mxu0 %v872_v0  ;;  %651 = vmatprep.subr.bf16.mxu1 %v872_v0  ;;  %v554_v25 = vld [vmem:[%s1043_s2] ss:$0 sm:$0xff]  ;;  %v738_v33 = vld [vmem:[#allocation7 + $0x70] sm:$0xff]   ;;  %v740_v35 = vld [vmem:[#allocation8] sm:$0xff]  }
  0x52   :  { %v739_v34 = vld [vmem:[#allocation7 + $0x78] sm:$0xff]   ;;  %v741_v36 = vld [vmem:[#allocation8 + $0x8] sm:$0xff]   ;;  %v742_v37 = vld [vmem:[#allocation8 + $0x10] sm:$0xff]  }
  0x53   :  { %v743_v38 = vld [vmem:[#allocation8 + $0x18] sm:$0xff]   ;;  %v744_v39 = vld [vmem:[#allocation8 + $0x20] sm:$0xff]   ;;  %v745_v40 = vld [vmem:[#allocation8 + $0x28] sm:$0xff]  }
  0x54   :  { %632 = vmatpush3.bf16.msra.mxu0 %v718_v3  ;;  %652 = vmatpush3.bf16.msra.mxu1 %v726_v8  ;;  %v563_v41 = vld [vmem:[%s1045_s4] ss:$0 sm:$0xff]  ;;  %v746_v49 = vld [vmem:[#allocation8 + $0x30] sm:$0xff]   ;;  %v573_v51 = vld [vmem:[%s1045_s4 + $0x1] ss:$0 sm:$0xff]  ;;  %s836_s4 = scalar_lea.vmem %s544_s8, 128 }
  0x55   :  { %633 = vmatprep.subr.bf16.mxu0 %v872_v0  ;;  %653 = vmatprep.subr.bf16.mxu1 %v872_v0  ;;  %v747_v50 = vld [vmem:[#allocation8 + $0x38] sm:$0xff]   ;;  %p837_p4 = scmp.ne.s32.totalorder %s544_s8, %s836_s4  ;;  %p842_p6 = scmp.lt.s32.totalorder %s836_s4, %s836_s4 }
  0x56   :  { %v582_v59 = vld [vmem:[%s1047_s6] ss:$0 sm:$0xff] }
  0x57   :  { %p843_p7 = por %p842_p6, %p841_p5 }
  0x58   :  { %634 = vmatpush3.bf16.msra.mxu0 %v719_v5  ;;  %654 = vmatpush3.bf16.msra.mxu1 %v727_v10 }
  0x59   :  { %635 = vmatprep.subr.bf16.mxu0 %v872_v0  ;;  %655 = vmatprep.subr.bf16.mxu1 %v872_v0  ;;  %p844_p8 = pnand %p843_p7, %p837_p4 }
  0x5c   :  { %636 = vmatpush3.bf16.msra.mxu0 %v720_v7  ;;  %656 = vmatpush3.bf16.msra.mxu1 %v728_v12 }
  0x5d   :  { %637 = vmatprep.subr.bf16.mxu0 %v872_v0  ;;  %657 = vmatprep.subr.bf16.mxu1 %v872_v0 }
  0x60   :  { %638 = vmatpush3.bf16.msra.mxu0 %v721_v9  ;;  %658 = vmatpush3.bf16.msra.mxu1 %v729_v15 }
  0x61   :  { %639 = vmatprep.subr.bf16.mxu0 %v872_v0  ;;  %659 = vmatprep.subr.bf16.mxu1 %v872_v0 }
  0x64   :  { %640 = vmatpush3.bf16.msra.mxu0 %v722_v11  ;;  %660 = vmatpush3.bf16.msra.mxu1 %v730_v17 }
  0x65   :  { %641 = vmatprep.subr.bf16.mxu0 %v872_v0  ;;  %661 = vmatprep.subr.bf16.mxu1 %v872_v0 }
  0x68   :  { %642 = vmatpush3.bf16.msra.mxu0 %v723_v13  ;;  %662 = vmatpush3.bf16.msra.mxu1 %v731_v18 }
  0x69   :  { %667 = vmatprep.subr.bf16.mxu0 %v872_v0  ;;  %687 = vmatprep.subr.bf16.mxu1 %v872_v0 }
  0x6b   :  { %644 = vmatmul.mubr.bf16.vlgmr.msra.gmra.mrb[0].mxu0 %v82_v16 }
  0x6c   :  { %683 = vmatprep.mubr.msk.bf16.mxu0 %vm873_vm0, %v872_v0  ;;  %668 = vmatpush3.bf16.msra.mxu0 %v732_v19 }
  0x6d   :  { %669 = vmatprep.subr.bf16.mxu0 %v872_v0 }
  0x70   :  { %670 = vmatpush3.bf16.msra.mxu0 %v733_v20 }
  0x71   :  { %671 = vmatprep.subr.bf16.mxu0 %v872_v0 }
  0x74   :  { %672 = vmatpush3.bf16.msra.mxu0 %v734_v21 }
  0x75   :  { %673 = vmatprep.subr.bf16.mxu0 %v872_v0 }
  0x78   :  { %674 = vmatpush3.bf16.msra.mxu0 %v735_v22 }
  0x79   :  { %675 = vmatprep.subr.bf16.mxu0 %v872_v0 }
  0x7c   :  { %676 = vmatpush3.bf16.msra.mxu0 %v736_v23 }
  0x7d   :  { %677 = vmatprep.subr.bf16.mxu0 %v872_v0 }
  0x80   :  { %678 = vmatpush3.bf16.msra.mxu0 %v737_v24 }
  0x81   :  { %679 = vmatprep.subr.bf16.mxu0 %v872_v0 }
  0x84   :  { %680 = vmatpush3.bf16.msra.mxu0 %v738_v33 }
  0x85   :  { %681 = vmatprep.subr.bf16.mxu0 %v872_v0 }
  0x88   :  { %682 = vmatpush3.bf16.msra.mxu0 %v739_v34 }
 0x13e   :  { %v188_v26 = vpop.f32.mrb[0].mxu0 }
 0x13f   :  { %v189_v27 = vadd.f32 %v554_v25, %v188_v26  ;;  %v645_v28 = vpop.f32.mrb[1].mxu0 }
 0x140   :  { %v191_v29 = vpop.f32.mrb[2].mxu0 }
 0x141   :  { %v194_v30 = vmax.f32 %v189_v27, 0.0  ;;  %v646_v31 = vpop.f32.mrb[3].mxu0 }
 0x143   :  { %v195_v32 = vpack.c.bf16 %v194_v30, %v194_v30 }
 0x145   :  { %664 = vmatmul.mubr.bf16.vlgmr.msra.gmra.mrb[0].mxu1 %v195_v32 }
 0x146   :  { %703 = vmatprep.mubr.msk.bf16.mxu1 %vm873_vm0, %v872_v0  ;;  %688 = vmatpush3.bf16.msra.mxu1 %v740_v35 }
 0x147   :  { %689 = vmatprep.subr.bf16.mxu1 %v872_v0 }
 0x14a   :  { %690 = vmatpush3.bf16.msra.mxu1 %v741_v36 }
 0x14b   :  { %691 = vmatprep.subr.bf16.mxu1 %v872_v0 }
 0x14e   :  { %692 = vmatpush3.bf16.msra.mxu1 %v742_v37 }
 0x14f   :  { %693 = vmatprep.subr.bf16.mxu1 %v872_v0 }
 0x152   :  { %694 = vmatpush3.bf16.msra.mxu1 %v743_v38 }
 0x153   :  { %695 = vmatprep.subr.bf16.mxu1 %v872_v0 }
 0x156   :  { %696 = vmatpush3.bf16.msra.mxu1 %v744_v39 }
 0x157   :  { %697 = vmatprep.subr.bf16.mxu1 %v872_v0 }
 0x15a   :  { %698 = vmatpush3.bf16.msra.mxu1 %v745_v40 }
 0x15b   :  { %699 = vmatprep.subr.bf16.mxu1 %v872_v0 }
 0x15e   :  { %700 = vmatpush3.bf16.msra.mxu1 %v746_v49 }
 0x15f   :  { %701 = vmatprep.subr.bf16.mxu1 %v872_v0 }
 0x162   :  { %702 = vmatpush3.bf16.msra.mxu1 %v747_v50 }
 0x218   :  { %v301_v42 = vpop.f32.mrb[0].mxu1 }
 0x219   :  { %v302_v43 = vadd.f32 %v563_v41, %v301_v42  ;;  %v665_v44 = vpop.f32.mrb[1].mxu1 }
 0x21a   :  { %v304_v45 = vpop.f32.mrb[2].mxu1 }
 0x21b   :  { %v307_v46 = vmax.f32 %v302_v43, 0.0  ;;  %v666_v47 = vpop.f32.mrb[3].mxu1 }
 0x21d   :  { %v308_v48 = vpack.c.bf16 %v307_v46, %v307_v46 }
 0x21f   :  { %684 = vmatmul.mubr.bf16.vlgmr.msra.gmra.mrb[4].mxu0 %v308_v48 }
 0x2f2   :  { %v416_v52 = vpop.f32.mrb[4].mxu0 }
 0x2f3   :  { %v417_v53 = vadd.f32 %v573_v51, %v416_v52  ;;  %v685_v54 = vpop.f32.mrb[5].mxu0 }
 0x2f4   :  { %v419_v55 = vpop.f32.mrb[6].mxu0 }
 0x2f5   :  { %v422_v56 = vmax.f32 %v417_v53, 0.0  ;;  %v686_v57 = vpop.f32.mrb[7].mxu0 }
 0x2f7   :  { %v423_v58 = vpack.c.bf16 %v422_v56, %v422_v56 }
 0x2f9   :  { %704 = vmatmul.mubr.bf16.vlgmr.msra.gmra.mrb[4].mxu1 %v423_v58 }
 0x3cc   :  { %v529_v60 = vpop.f32.mrb[4].mxu1 }
 0x3cd   :  { %v530_v61 = vadd.f32 %v582_v59, %v529_v60  ;;  %v705_v62 = vpop.f32.mrb[5].mxu1 }
 0x3ce   :  { %v532_v63 = vpop.f32.mrb[6].mxu1 }
 0x3cf   :  { %v535_v0 = vadd.f32 %v530_v61, %v988_v14  ;;  %v706_v1 = vpop.f32.mrb[7].mxu1 }
 0x3d1   :  { %536 = vst [vmem:[#allocation10] sm:$0xff] %v535_v0 }
 0x3d2   :  { %847 = shalt.err (!%p844_p8)
}
 0x3d3   :  { %s848_s10 = scalar_lea.hbm %s1048_s7, 128 }
 0x3d4   :  { %p849_p9 = scmp.ne.s32.totalorder %s1048_s7, %s848_s10  ;;  %p852_p10 = scmp.lt.u32.totalorder %s848_s10, %s1048_s7 }
 0x3d6   :  { %p854_p11 = pnand %p852_p10, %p849_p9 }
 0x3d8   :  { %857 = shalt.err (!%p854_p11)
}
 0x3d9   :  { %546 = dma.vmem_to_hbm [thread:$0]  %s544_s8, 128, %s1048_s7, [#allocation4]  }
 0x3da   :  { %864 = dma.done.wait [#allocation4], 128  }
 0x3db   :  { %865 = vsyncadd [#allocation4], 4294967168 }
 0x3dc   :  { %550 = vsyncpa [#allocation3], 1 }
 0x3dd   :  { %551 = vsyncpa [#allocation6], 1 }
 0x3de   :  { %552 = vsyncpa [#allocation9], 1 }
 0x3df   :  { %553 = vsyncpa [#allocation4], 1 }

</bundles_post_ra>
